<compile_context>
chip_gen: v5e
topology: v5e:2x2
jax: 0.10.0
libtpu: 0.0.40
codegen_flags: <defaults>
</compile_context>

<pallas_src>
import math

import jax
import jax.numpy as jnp
from jax.experimental import pallas as pl
from jax.experimental.pallas import tpu as pltpu


def _mog_kernel(x_ref, std_ref, mean_ref, o_ref):
    # Pure VPU FMA in f32; (1, tl) std/mean broadcast over the sublane axis.
    x = x_ref[...].astype(jnp.float32)
    o_ref[...] = (x * std_ref[...] + mean_ref[...]).astype(o_ref.dtype)


def _cdiv(a, b):
    return -(-a // b)


def mog_layer(x, std, mean, *, target_tile_bytes=8 * 1024 * 1024):
    """Apply out = x * std + mean with per-feature std/mean via Pallas.

    x:    (..., D) array (any float dtype; compute happens in f32)
    std:  (D,)     float32 parameter
    mean: (D,)     float32 parameter
    """
    orig_shape = x.shape
    D = orig_shape[-1]
    x2 = x.reshape(-1, D)
    B = x2.shape[0]

    std_f = std.reshape(-1).astype(jnp.float32)
    mean_f = mean.reshape(-1).astype(jnp.float32)

    # ---- Lane densification: make the working last dim a multiple of 128 ---
    # Either fold rows together (pack) or zero-pad the feature dim, whichever
    # wastes fewer bytes of HBM traffic. Result: Dp % 128 == 0 always.
    if D % 128 == 0:
        pack, col_pad = 1, 0
    else:
        pack_full = math.lcm(D, 128) // D
        rows_padded = _cdiv(B, pack_full) * pack_full
        row_waste = (rows_padded - B) * D          # padded elements (row-pack)
        col_pad_amt = (-D) % 128
        col_waste = B * col_pad_amt                # padded elements (col-pad)
        if row_waste <= col_waste:
            pack, col_pad = pack_full, 0
        else:
            pack, col_pad = 1, col_pad_amt

    if col_pad:
        x2 = jnp.pad(x2, ((0, 0), (0, col_pad)))
        std_w = jnp.pad(std_f, (0, col_pad))
        mean_w = jnp.pad(mean_f, (0, col_pad))
        D_work, B_work = D + col_pad, B
    else:
        std_w, mean_w, D_work = std_f, mean_f, D
        row_pad = (-B) % pack
        if row_pad:
            x2 = jnp.pad(x2, ((0, row_pad), (0, 0)))
        B_work = B + row_pad

    Rp = B_work // pack
    Dp = D_work * pack

    x_p = x2.reshape(Rp, Dp)
    std_p = jnp.tile(std_w, pack).reshape(1, Dp)     # stays f32
    mean_p = jnp.tile(mean_w, pack).reshape(1, Dp)   # stays f32

    # ---- Tile-size derivation (dtype-aware sublane multiple) ----------------
    itemsize = jnp.dtype(x.dtype).itemsize
    sub_mult = max(8, 32 // max(itemsize, 1))        # 8 f32 / 16 bf16 / 32 i8

    # Lane tile: multiple of 128, big enough that sub_mult rows fit the budget.
    max_tl = max(128, (target_tile_bytes // (sub_mult * itemsize)) // 128 * 128)
    tl = min(Dp, max_tl)

    # Row tile: fill the byte budget, keep >= ~4 grid steps for large inputs
    # (DMA/compute overlap + v7x dual-TC sharding), sublane-aligned.
    if Rp <= sub_mult:
        tb = Rp                                      # full extent (always legal)
    else:
        row_budget = max(sub_mult, target_tile_bytes // max(tl * itemsize, 1))
        tb = min(Rp, row_budget)
        if Rp >= 4 * sub_mult:
            tb = min(tb, _cdiv(Rp, 4))
        tb = max(sub_mult, (tb // sub_mult) * sub_mult)

    grid = (_cdiv(Rp, tb), _cdiv(Dp, tl))

    out_p = pl.pallas_call(
        _mog_kernel,
        out_shape=jax.ShapeDtypeStruct((Rp, Dp), x.dtype),
        grid_spec=pl.GridSpec(
            grid=grid,
            in_specs=[
                pl.BlockSpec((tb, tl), lambda i, j: (i, j)),   # x tile
                pl.BlockSpec((1, tl), lambda i, j: (0, j)),    # std (resident row)
                pl.BlockSpec((1, tl), lambda i, j: (0, j)),    # mean (resident row)
            ],
            out_specs=pl.BlockSpec((tb, tl), lambda i, j: (i, j)),
        ),
        compiler_params=pltpu.CompilerParams(
            # Independent elementwise tiles -> both axes shardable on v7x.
            dimension_semantics=("parallel", "parallel"),
            vmem_limit_bytes=48 * 1024 * 1024,
        ),
    )(x_p, std_p, mean_p)

    # ---- Undo packing / padding ---------------------------------------------
    out2 = out_p.reshape(B_work, D_work)
    if col_pad:
        out2 = out2[:, :D]
    if B_work != B:
        out2 = out2[:B]
    return out2.reshape(orig_shape)


def _ref(x, std, mean):
    y = x.astype(jnp.float32) * std[None, :].astype(jnp.float32) \
        + mean[None, :].astype(jnp.float32)
    return y.astype(x.dtype)


if __name__ == "__main__":
    key = jax.random.PRNGKey(0)
    k_x, k_std, k_mean, k_x2, k_x3, k_x4, k_x5 = jax.random.split(key, 7)

    # ---- Test 1: small shapes consistent with MoGLayer on a noise vector ----
    # batch=8, input_dim=32 (input_dim >= 2 as asserted in build()).
    B, D = 8, 32
    # std ~ U(0.5, 1.0) (kernel_initializer), mean ~ U(-0.05, 0.05) (bias_initializer)
    std = jax.random.uniform(k_std, (D,), jnp.float32, minval=0.5, maxval=1.0)
    mean = jax.random.uniform(k_mean, (D,), jnp.float32, minval=-0.05, maxval=0.05)
    x = jax.random.normal(k_x, (B, D), jnp.float32)

    out = jax.block_until_ready(mog_layer(x, std, mean))
    assert out.shape == (B, D)
    assert jnp.allclose(out, _ref(x, std, mean), atol=1e-6), "mismatch (small)"

    # ---- Test 2: multi-step tiled/pipelined path (small budget on purpose) --
    B2, D2 = 1024, 256
    x2 = jax.random.normal(k_x2, (B2, D2), jnp.float32)
    std2 = jax.random.uniform(k_std, (D2,), jnp.float32, minval=0.5, maxval=1.0)
    mean2 = jax.random.uniform(k_mean, (D2,), jnp.float32, minval=-0.05, maxval=0.05)
    out2 = jax.block_until_ready(
        mog_layer(x2, std2, mean2, target_tile_bytes=64 * 1024))
    assert jnp.allclose(out2, _ref(x2, std2, mean2), atol=1e-6), "mismatch (tiled)"

    # ---- Test 3: generalized row-packing with row padding (B % pack != 0) ---
    B3, D3 = 37, 48                       # pack = lcm(48,128)/48 = 8, rows padded to 40
    x3 = jax.random.normal(k_x3, (B3, D3), jnp.float32)
    std3 = jax.random.uniform(k_std, (D3,), jnp.float32, minval=0.5, maxval=1.0)
    mean3 = jax.random.uniform(k_mean, (D3,), jnp.float32, minval=-0.05, maxval=0.05)
    out3 = jax.block_until_ready(mog_layer(x3, std3, mean3))
    assert jnp.allclose(out3, _ref(x3, std3, mean3), atol=1e-6), "mismatch (row-pack)"

    # ---- Test 4: column-padding path (col-pad cheaper than row-pack) --------
    B4, D4 = 4, 200                       # pad D -> 256, slice back after
    x4 = jax.random.normal(k_x4, (B4, D4), jnp.float32)
    std4 = jax.random.uniform(k_std, (D4,), jnp.float32, minval=0.5, maxval=1.0)
    mean4 = jax.random.uniform(k_mean, (D4,), jnp.float32, minval=-0.05, maxval=0.05)
    out4 = jax.block_until_ready(mog_layer(x4, std4, mean4))
    assert jnp.allclose(out4, _ref(x4, std4, mean4), atol=1e-6), "mismatch (col-pad)"

    # ---- Test 5: bf16 input, f32 params (dtype-aware sublane tile) ----------
    B5, D5 = 64, 128
    x5 = jax.random.normal(k_x5, (B5, D5), jnp.float32).astype(jnp.bfloat16)
    std5 = jax.random.uniform(k_std, (D5,), jnp.float32, minval=0.5, maxval=1.0)
    mean5 = jax.random.uniform(k_mean, (D5,), jnp.float32, minval=-0.05, maxval=0.05)
    out5 = jax.block_until_ready(mog_layer(x5, std5, mean5))
    assert out5.dtype == jnp.bfloat16
    assert jnp.allclose(out5.astype(jnp.float32),
                        _ref(x5, std5, mean5).astype(jnp.float32),
                        atol=2e-2), "mismatch (bf16)"

    print("KERNEL_OK")
</pallas_src>

<mosaic_0001>
module attributes {stable_mosaic.version = 11 : i64} {
  func.func @_mog_kernel(%arg0: i32, %arg1: i32, %arg2: memref<2x128xf32, #tpu.memory_space<vmem>>, %arg3: memref<1x128xf32, #tpu.memory_space<vmem>>, %arg4: memref<1x128xf32, #tpu.memory_space<vmem>>, %arg5: memref<2x128xf32, #tpu.memory_space<vmem>>) attributes {dimension_semantics = [#tpu.dimension_semantics<parallel>, #tpu.dimension_semantics<parallel>], iteration_bounds = array<i64: 1, 1>, scalar_prefetch = 0 : i64, scratch_operands = 0 : i64, tpu.core_type = #tpu.core_type<tc>, window_params = [{transform_indices = @transform_0, window_bounds = array<i64: 2, 128>}, {transform_indices = @transform_1, window_bounds = array<i64: 1, 128>}, {transform_indices = @transform_2, window_bounds = array<i64: 1, 128>}, {transform_indices = @transform_3, window_bounds = array<i64: 2, 128>}]} {
    %c0 = arith.constant 0 : index
    %c0_0 = arith.constant 0 : index
    %0 = vector.load %arg2[%c0, %c0_0] : memref<2x128xf32, #tpu.memory_space<vmem>>, vector<2x128xf32>
    %c0_1 = arith.constant 0 : index
    %c0_2 = arith.constant 0 : index
    %1 = vector.load %arg3[%c0_1, %c0_2] : memref<1x128xf32, #tpu.memory_space<vmem>>, vector<1x128xf32>
    %2 = vector.broadcast %1 : vector<1x128xf32> to vector<2x128xf32>
    %3 = arith.mulf %0, %2 : vector<2x128xf32>
    %c0_3 = arith.constant 0 : index
    %c0_4 = arith.constant 0 : index
    %4 = vector.load %arg4[%c0_3, %c0_4] : memref<1x128xf32, #tpu.memory_space<vmem>>, vector<1x128xf32>
    %5 = vector.broadcast %4 : vector<1x128xf32> to vector<2x128xf32>
    %6 = arith.addf %3, %5 : vector<2x128xf32>
    %c0_5 = arith.constant 0 : index
    %c0_6 = arith.constant 0 : index
    %7 = vector.load %arg5[%c0_5, %c0_6] : memref<2x128xf32, #tpu.memory_space<vmem>>, vector<2x128xf32>
    tpu.vector_store %arg5[%c0_5, %c0_6], %6 {strides = array<i32>} : memref<2x128xf32, #tpu.memory_space<vmem>>, vector<2x128xf32>,
    return
  }
  func.func @transform_0(%arg0: i32, %arg1: i32) -> (i32, i32) {
    %c0_i32 = arith.constant 0 : i32
    return %arg0, %arg1 : i32, i32
  }
  func.func @transform_1(%arg0: i32, %arg1: i32) -> (i32, i32) {
    %c0_i32 = arith.constant 0 : i32
    %c0_i32_0 = arith.constant 0 : i32
    return %c0_i32, %arg1 : i32, i32
  }
  func.func @transform_2(%arg0: i32, %arg1: i32) -> (i32, i32) {
    %c0_i32 = arith.constant 0 : i32
    %c0_i32_0 = arith.constant 0 : i32
    return %c0_i32, %arg1 : i32, i32
  }
  func.func @transform_3(%arg0: i32, %arg1: i32) -> (i32, i32) {
    %c0_i32 = arith.constant 0 : i32
    return %arg0, %arg1 : i32, i32
  }
}

</mosaic_0001>

<bundles_post_ra>
// kernel: tpu_custom_call.1
= control target key start
LH: loop header
LB: loop body
LE: loop exit
PB: predicated region body
PF: predicated region fallthrough
CT: control target
= control target key end

     0   :  { %8 = vsyncpa [#allocation3], 0  ;;  %s191_s0 = inlined_call_operand.hbm [shape: f32[2,128], index: 0, kind: input, shape index: {}]   ;;  %s192_s1 = inlined_call_operand.hbm [shape: f32[1,128], index: 1, kind: input, shape index: {}]   ;;  %s193_s2 = inlined_call_operand.vmem [shape: f32[1,128], index: 2, kind: input, shape index: {}]   ;;  %s194_s3 = inlined_call_operand.hbm [shape: f32[2,128], index: 3, kind: output, shape index: {}]  }
   0x1   :  { %9 = vsyncpa [#allocation6], 0 }
   0x2   :  { %10 = vsyncpa [#allocation4], 0  ;;  %s16_s14 = sshll.u32 %s191_s0, 4  ;;  %s156_s15 = smov [#allocation2]   ;;  %s17_s14 = int_to_ptr.hbm [resolvable:$true] %s16_s14 }
   0x3   :  { %s18_s16 = sshll.u32 %s156_s15, 4  ;;  %s27_s19 = sshll.u32 %s192_s1, 4  ;;  %s19_s16 = int_to_ptr.vmem [resolvable:$true] %s18_s16  ;;  %s28_s19 = int_to_ptr.hbm [resolvable:$true] %s27_s19 }
   0x4   :  { %21 = dma.hbm_to_vmem [thread:$0]  %s17_s14, 32, %s19_s16, [#allocation3]  }
   0x5   :  { %s157_s20 = smov [#allocation5]  }
   0x6   :  { %s29_s21 = sshll.u32 %s157_s20, 4  ;;  %s30_s21 = int_to_ptr.vmem [resolvable:$true] %s29_s21 }
   0x7   :  { %32 = dma.hbm_to_vmem [thread:$0]  %s28_s19, 16, %s30_s21, [#allocation6]  }
   0x8   :  { %150 = dma.done.wait [#allocation3], 32  }
   0x9   :  { %151 = vsyncadd [#allocation3], 4294967264 }
   0xa   :  { %152 = dma.done.wait [#allocation6], 16  }
   0xb   :  { %153 = vsyncadd [#allocation6], 4294967280  ;;  %v43_v0 = vld [vmem:[#allocation2] sm:$0x3]  ;;  %v76_v1 = vld [vmem:[#allocation5] ss:$0 sm:$0xff] }
   0xc   :  { %v77_v2 = vld [vmem:[%s193_s2] ss:$0 sm:$0xff]  ;;  %s158_s23 = smov [#allocation7]   ;;  %s62_s26 = sshll.u32 %s194_s3, 4  ;;  %v48_v3 = vmul.f32 %v76_v1, %v43_v0  ;;  %s63_s26 = int_to_ptr.hbm [resolvable:$true] %s62_s26 }
   0xd   :  { %s60_s24 = sshll.u32 %s158_s23, 4  ;;  %s61_s24 = int_to_ptr.vmem [resolvable:$true] %s60_s24 }
   0xe   :  { %v53_v4 = vadd.f32 %v77_v2, %v48_v3 }
  0x10   :  { %54 = vst [vmem:[#allocation7] sm:$0x3] %v53_v4 }
  0x11   :  { %65 = dma.vmem_to_hbm [thread:$0]  %s61_s24, 32, %s63_s26, [#allocation4]  }
  0x12   :  { %154 = dma.done.wait [#allocation4], 32  }
  0x13   :  { %155 = vsyncadd [#allocation4], 4294967264 }
  0x14   :  { %70 = vsyncpa [#allocation3], 1 }
  0x15   :  { %71 = vsyncpa [#allocation6], 1 }
  0x16   :  { %72 = vsyncpa [#allocation4], 1 }

</bundles_post_ra>
